<compile_context>
chip_gen: v5e
topology: v5e:2x2
jax: 0.10.0
libtpu: 0.0.40
codegen_flags: <defaults>
</compile_context>

<pallas_src>
import math

import jax
import jax.numpy as jnp
from jax.experimental import pallas as pl
from jax.experimental.pallas import tpu as pltpu

_GELU_C = math.sqrt(2.0 / math.pi)


def _new_gelu(x):
    # 0.5 * x * (1 + tanh(sqrt(2/pi) * (x + 0.044715 * x^3)))
    return 0.5 * x * (1.0 + jnp.tanh(_GELU_C * (x + 0.044715 * (x * x * x))))


def _round_up(x, m):
    return (x + m - 1) // m * m


def _sublane(dtype):
    # Sub-32-bit dtypes pack along sublanes: 8 rows (f32), 16 (bf16), 32 (i8/fp8).
    return 8 * max(1, 4 // jnp.dtype(dtype).itemsize)


def _vmem_capacity_bytes():
    try:
        cap = getattr(pltpu.get_tpu_info(), "vmem_capacity_bytes", None)
        if cap:
            return int(cap)
    except Exception:
        pass
    return 64 * 1024 * 1024  # conservative (v7x-sized) fallback


def _choose_tile_h(hidden, target=512):
    """Largest multiple-of-128 divisor of `hidden` that is <= target (else full)."""
    t = min(target, hidden)
    t -= t % 128
    while t >= 128 and hidden % t != 0:
        t -= 128
    return t if t >= 128 else hidden


def _choose_tile_m(M, target, sublane):
    """Row tile rounded to the sublane packing; prefer an exact divisor of M so
    no jnp.pad / output-slice copies are materialized."""
    target = max(sublane, min(_round_up(target, sublane), _round_up(M, sublane)))
    if M % sublane == 0:
        t = min(target, M)
        t -= t % sublane
        while t >= sublane and M % t != 0:
            t -= sublane
        if t >= sublane and 4 * t >= min(target, M):
            return t, M          # no padding
    m_pad = _round_up(M, target)
    return target, m_pad


def _stream_footprint(tile_m, tile_h, dim, itemsize):
    """Approximate VMEM bytes for the streaming path (x single-buffered)."""
    acc = tile_m * dim * 4                      # f32 accumulator scratch
    x_buf = tile_m * dim * itemsize             # x, pl.Buffered(1)
    out_buf = 2 * tile_m * dim * itemsize       # output, double-buffered
    w_buf = 2 * 2 * dim * tile_h * itemsize     # W1 + W2 tiles, double-buffered
    interm = tile_m * tile_h * (4 + itemsize)   # f32 gelu slab + native-dtype copy
    bias = 2 * 2 * (tile_h + dim) * itemsize
    return acc + x_buf + out_buf + w_buf + interm + bias


def _resident_footprint(tile_m, dim, hidden, itemsize):
    """Approximate VMEM bytes when W1/W2 are fully resident."""
    w = 2 * 2 * dim * hidden * itemsize         # W1 + W2 (assume double-buffered)
    x_out = 2 * 2 * tile_m * dim * itemsize     # x + out, double-buffered
    interm = tile_m * hidden * (4 + itemsize)   # f32 hidden slab + native-dtype copy
    bias = 2 * (hidden + dim) * itemsize
    return w + x_out + interm + bias


def _mlp_resident_kernel(x_ref, w1_ref, b1_ref, w2_ref, b2_ref, o_ref):
    """Weights fully resident in VMEM: one row-tile does the whole MLP."""
    x = x_ref[...]
    h = jnp.dot(x, w1_ref[...], preferred_element_type=jnp.float32)
    h = _new_gelu(h + b1_ref[...].astype(jnp.float32))
    out = jnp.dot(h.astype(x.dtype), w2_ref[...], preferred_element_type=jnp.float32)
    o_ref[...] = (out + b2_ref[...].astype(jnp.float32)).astype(o_ref.dtype)


def _mlp_stream_kernel(x_ref, w1_ref, b1_ref, w2_ref, b2_ref, o_ref, acc_ref):
    """Hidden-streaming path: one (row-tile, hidden-tile) partial contribution."""
    h_idx = pl.program_id(1)
    x = x_ref[...]
    h = jnp.dot(x, w1_ref[...], preferred_element_type=jnp.float32)
    h = _new_gelu(h + b1_ref[...].astype(jnp.float32))
    # Partial contribution of this hidden tile to the (tile_m, dim) output.
    part = jnp.dot(h.astype(x.dtype), w2_ref[...], preferred_element_type=jnp.float32)

    @pl.when(h_idx == 0)
    def _first():
        acc_ref[...] = part          # direct write: no zero-fill + reload

    @pl.when(h_idx > 0)
    def _rest():
        acc_ref[...] += part

    @pl.when(h_idx == pl.num_programs(1) - 1)
    def _finalize():
        o_ref[...] = (acc_ref[...] + b2_ref[...].astype(jnp.float32)).astype(o_ref.dtype)


def mlp_forward(x, w_fc_t, b_fc, w_proj_t, b_proj, *, tile_m=None, tile_h=None):
    """Fused MLP forward (dropout = identity, eval mode).

    x:        (B, T, dim)
    w_fc_t:   (dim, hidden)   c_fc weight, pre-transposed to (in, out)
    b_fc:     (hidden,)
    w_proj_t: (hidden, dim)   c_proj weight, pre-transposed to (in, out)
    b_proj:   (dim,)
    """
    B, T, dim = x.shape
    hidden = w_fc_t.shape[1]
    M = B * T
    itemsize = jnp.dtype(x.dtype).itemsize
    sub = _sublane(x.dtype)

    vmem_cap = _vmem_capacity_bytes()
    budget = int(vmem_cap * 0.75)

    x2d = x.reshape(M, dim)
    b1 = b_fc.reshape(1, hidden)
    b2 = b_proj.reshape(1, dim)

    # Row-tile candidates, largest first.  Streaming-path arithmetic intensity
    # is ~tile_m FLOPs / weight byte (bf16), so bigger is better; VMEM caps it.
    candidates = [c for c in (1024, 896, 768, 640, 512, 448, 384, 320, 256,
                              192, 128, 96, 64, 32, 16, 8) if c % sub == 0]

    use_resident = (
        _resident_footprint(min(128, _round_up(M, sub)), dim, hidden, itemsize)
        <= budget
    )

    if use_resident:
        if tile_m is None:
            tile_m = next(
                (c for c in candidates
                 if _resident_footprint(c, dim, hidden, itemsize) <= budget), sub)
        tile_m, m_pad = _choose_tile_m(M, tile_m, sub)
        footprint = _resident_footprint(tile_m, dim, hidden, itemsize)
    else:
        if tile_h is None:
            tile_h = _choose_tile_h(hidden)
        if tile_m is None:
            tile_m = next(
                (c for c in candidates
                 if _stream_footprint(c, tile_h, dim, itemsize) <= budget), sub)
        tile_m, m_pad = _choose_tile_m(M, tile_m, sub)
        footprint = _stream_footprint(tile_m, tile_h, dim, itemsize)

    if m_pad != M:  # rare: only when no reasonable divisor of M exists
        x2d = jnp.pad(x2d, ((0, m_pad - M), (0, 0)))

    # Scoped-VMEM limit sized from the block footprint, 8 MiB below physical.
    vmem_limit = int(min(vmem_cap - (8 << 20),
                         max(footprint + (8 << 20), 32 << 20)))

    n_row = m_pad // tile_m
    weight_bytes = (w_fc_t.size * w_fc_t.dtype.itemsize
                    + w_proj_t.size * w_proj_t.dtype.itemsize
                    + b1.size * b1.dtype.itemsize
                    + b2.size * b2.dtype.itemsize)
    act_bytes = (x2d.size + m_pad * dim) * itemsize
    flops = 4 * m_pad * dim * hidden  # two matmuls, 2 flops / MAC

    if use_resident:
        grid = (n_row,)
        in_specs = [
            pl.BlockSpec((tile_m, dim), lambda i: (i, 0)),   # x rows
            pl.BlockSpec((dim, hidden), lambda i: (0, 0)),   # W1, resident
            pl.BlockSpec((1, hidden), lambda i: (0, 0)),     # b1
            pl.BlockSpec((hidden, dim), lambda i: (0, 0)),   # W2, resident
            pl.BlockSpec((1, dim), lambda i: (0, 0)),        # b2
        ]
        out_spec = pl.BlockSpec((tile_m, dim), lambda i: (i, 0))
        kernel = _mlp_resident_kernel
        scratch = []
        dim_sem = ("parallel",)
        bytes_accessed = weight_bytes + act_bytes            # weights DMA'd once
    else:
        grid = (n_row, hidden // tile_h)
        in_specs = [
            # x only changes on the outer row axis: single-buffer it to spend
            # the reclaimed VMEM on a larger tile_m (matters most on v7x).
            pl.BlockSpec((tile_m, dim), lambda i, h: (i, 0),
                         pipeline_mode=pl.Buffered(1)),
            pl.BlockSpec((dim, tile_h), lambda i, h: (0, h)),  # W1 hidden tile
            pl.BlockSpec((1, tile_h), lambda i, h: (0, h)),    # b1 hidden tile
            pl.BlockSpec((tile_h, dim), lambda i, h: (h, 0)),  # W2 hidden tile
            pl.BlockSpec((1, dim), lambda i, h: (0, 0)),       # b2
        ]
        out_spec = pl.BlockSpec((tile_m, dim), lambda i, h: (i, 0))
        kernel = _mlp_stream_kernel
        scratch = [pltpu.VMEM((tile_m, dim), jnp.float32)]
        dim_sem = ("parallel", "arbitrary")
        # Weights are re-streamed once per row tile: reflect that in the hint.
        bytes_accessed = n_row * weight_bytes + act_bytes

    out2d = pl.pallas_call(
        kernel,
        out_shape=jax.ShapeDtypeStruct((m_pad, dim), x.dtype),
        grid_spec=pltpu.PrefetchScalarGridSpec(
            num_scalar_prefetch=0,
            grid=grid,
            in_specs=in_specs,
            out_specs=out_spec,
            scratch_shapes=scratch,
        ),
        compiler_params=pltpu.CompilerParams(
            dimension_semantics=dim_sem,
            vmem_limit_bytes=vmem_limit,
        ),
        cost_estimate=pl.CostEstimate(
            flops=flops,
            transcendentals=m_pad * hidden,   # one tanh per hidden activation
            bytes_accessed=bytes_accessed,
        ),
    )(x2d, w_fc_t, b1, w_proj_t, b2)

    if m_pad != M:
        out2d = out2d[:M]
    return out2d.reshape(B, T, dim)


def mlp_reference(x, w_fc, b_fc, w_proj, b_proj):
    """Plain-JAX reference mirroring the PyTorch forward (PyTorch (out,in) weights)."""
    h = jnp.einsum("btd,hd->bth", x, w_fc) + b_fc
    h = _new_gelu(h)
    out = jnp.einsum("bth,dh->btd", h, w_proj) + b_proj
    return out  # dropout is identity in eval


if __name__ == "__main__":
    # Small shapes consistent with the module: batch=2, seq=8, dim=32.
    B, T, dim = 2, 8, 32
    hidden = 4 * dim

    key = jax.random.PRNGKey(0)
    kx, kw1, kb1, kw2, kb2 = jax.random.split(key, 5)

    x = jax.random.normal(kx, (B, T, dim), dtype=jnp.float32)

    # Deterministic parameters in PyTorch (out, in) layout.
    w_fc = jax.random.normal(kw1, (hidden, dim), dtype=jnp.float32) / math.sqrt(dim)
    b_fc = jax.random.normal(kb1, (hidden,), dtype=jnp.float32) * 0.01
    w_proj = jax.random.normal(kw2, (dim, hidden), dtype=jnp.float32) / math.sqrt(hidden)
    b_proj = jax.random.normal(kb2, (dim,), dtype=jnp.float32) * 0.01

    # One-time conversion to (in, out) layout at parameter-setup time.
    w_fc_t = jnp.asarray(w_fc.T)
    w_proj_t = jnp.asarray(w_proj.T)

    out = mlp_forward(x, w_fc_t, b_fc, w_proj_t, b_proj)
    out = jax.block_until_ready(out)

    ref = mlp_reference(x, w_fc, b_fc, w_proj, b_proj)
    assert out.shape == (B, T, dim)
    err = jnp.max(jnp.abs(out - ref))
    # f32-activation tolerance; bf16 runs cast the gelu output to bf16 before
    # the second matmul (intentional, MXU rate) and need a looser bound.
    assert jnp.allclose(out, ref, atol=1e-4, rtol=1e-4), f"max abs err {err}"

    print("KERNEL_OK")
</pallas_src>

<mosaic_0001>
module attributes {stable_mosaic.version = 11 : i64} {
  func.func @_mlp_resident_kernel(%arg0: i32, %arg1: memref<16x32xf32, #tpu.memory_space<vmem>>, %arg2: memref<32x128xf32, #tpu.memory_space<vmem>>, %arg3: memref<1x128xf32, #tpu.memory_space<vmem>>, %arg4: memref<128x32xf32, #tpu.memory_space<vmem>>, %arg5: memref<1x32xf32, #tpu.memory_space<vmem>>, %arg6: memref<16x32xf32, #tpu.memory_space<vmem>>) attributes {dimension_semantics = [#tpu.dimension_semantics<parallel>], iteration_bounds = array<i64: 1>, scalar_prefetch = 0 : i64, scratch_operands = 0 : i64, tpu.core_type = #tpu.core_type<tc>, window_params = [{transform_indices = @transform_0, window_bounds = array<i64: 16, 32>}, {pipeline_mode = #tpu.pipeline_mode<synchronous>, transform_indices = @transform_1, window_bounds = array<i64: 32, 128>}, {pipeline_mode = #tpu.pipeline_mode<synchronous>, transform_indices = @transform_2, window_bounds = array<i64: 1, 128>}, {pipeline_mode = #tpu.pipeline_mode<synchronous>, transform_indices = @transform_3, window_bounds = array<i64: 128, 32>}, {pipeline_mode = #tpu.pipeline_mode<synchronous>, transform_indices = @transform_4, window_bounds = array<i64: 1, 32>}, {transform_indices = @transform_5, window_bounds = array<i64: 16, 32>}]} {
    %c0 = arith.constant 0 : index
    %c0_0 = arith.constant 0 : index
    %0 = vector.load %arg1[%c0, %c0_0] : memref<16x32xf32, #tpu.memory_space<vmem>>, vector<16x32xf32>
    %c0_1 = arith.constant 0 : index
    %c0_2 = arith.constant 0 : index
    %1 = vector.load %arg2[%c0_1, %c0_2] : memref<32x128xf32, #tpu.memory_space<vmem>>, vector<32x128xf32>
    %cst = arith.constant dense<0.000000e+00> : vector<16x128xf32>
    %2 = tpu.matmul %0, %1, %cst {dimension_numbers = #tpu.dot_dimension_numbers<[1], [0], [0], [1], [0, 0, 1, 1], [], []>} : vector<16x32xf32>, vector<32x128xf32>, vector<16x128xf32> -> vector<16x128xf32>
    %c0_3 = arith.constant 0 : index
    %c0_4 = arith.constant 0 : index
    %3 = vector.load %arg3[%c0_3, %c0_4] : memref<1x128xf32, #tpu.memory_space<vmem>>, vector<1x128xf32>
    %4 = vector.broadcast %3 : vector<1x128xf32> to vector<16x128xf32>
    %5 = arith.addf %2, %4 : vector<16x128xf32>
    %cst_5 = arith.constant 5.000000e-01 : f32
    %6 = vector.broadcast %cst_5 : f32 to vector<16x128xf32>
    %7 = arith.mulf %6, %5 : vector<16x128xf32>
    %8 = arith.mulf %5, %5 : vector<16x128xf32>
    %9 = arith.mulf %8, %5 : vector<16x128xf32>
    %cst_6 = arith.constant 4.471500e-02 : f32
    %10 = vector.broadcast %cst_6 : f32 to vector<16x128xf32>
    %11 = arith.mulf %10, %9 : vector<16x128xf32>
    %12 = arith.addf %5, %11 : vector<16x128xf32>
    %cst_7 = arith.constant 0.797884583 : f32
    %13 = vector.broadcast %cst_7 : f32 to vector<16x128xf32>
    %14 = arith.mulf %13, %12 : vector<16x128xf32>
    %15 = math.tanh %14 : vector<16x128xf32>
    %cst_8 = arith.constant 1.000000e+00 : f32
    %16 = vector.broadcast %cst_8 : f32 to vector<16x128xf32>
    %17 = arith.addf %16, %15 : vector<16x128xf32>
    %18 = arith.mulf %7, %17 : vector<16x128xf32>
    %c0_9 = arith.constant 0 : index
    %c0_10 = arith.constant 0 : index
    %19 = vector.load %arg4[%c0_9, %c0_10] : memref<128x32xf32, #tpu.memory_space<vmem>>, vector<128x32xf32>
    %cst_11 = arith.constant dense<0.000000e+00> : vector<16x32xf32>
    %20 = tpu.matmul %18, %19, %cst_11 {dimension_numbers = #tpu.dot_dimension_numbers<[1], [0], [0], [1], [0, 0, 1, 1], [], []>} : vector<16x128xf32>, vector<128x32xf32>, vector<16x32xf32> -> vector<16x32xf32>
    %c0_12 = arith.constant 0 : index
    %c0_13 = arith.constant 0 : index
    %21 = vector.load %arg5[%c0_12, %c0_13] : memref<1x32xf32, #tpu.memory_space<vmem>>, vector<1x32xf32>
    %22 = vector.broadcast %21 : vector<1x32xf32> to vector<16x32xf32>
    %23 = arith.addf %20, %22 : vector<16x32xf32>
    %c0_14 = arith.constant 0 : index
    %c0_15 = arith.constant 0 : index
    %24 = vector.load %arg6[%c0_14, %c0_15] : memref<16x32xf32, #tpu.memory_space<vmem>>, vector<16x32xf32>
    tpu.vector_store %arg6[%c0_14, %c0_15], %23 {strides = array<i32>} : memref<16x32xf32, #tpu.memory_space<vmem>>, vector<16x32xf32>,
    return
  }
  func.func @transform_0(%arg0: i32) -> (i32, i32) {
    %c0_i32 = arith.constant 0 : i32
    %c0_i32_0 = arith.constant 0 : i32
    return %arg0, %c0_i32 : i32, i32
  }
  func.func @transform_1(%arg0: i32) -> (i32, i32) {
    %c0_i32 = arith.constant 0 : i32
    %c0_i32_0 = arith.constant 0 : i32
    %c0_i32_1 = arith.constant 0 : i32
    return %c0_i32, %c0_i32_0 : i32, i32
  }
  func.func @transform_2(%arg0: i32) -> (i32, i32) {
    %c0_i32 = arith.constant 0 : i32
    %c0_i32_0 = arith.constant 0 : i32
    %c0_i32_1 = arith.constant 0 : i32
    return %c0_i32, %c0_i32_0 : i32, i32
  }
  func.func @transform_3(%arg0: i32) -> (i32, i32) {
    %c0_i32 = arith.constant 0 : i32
    %c0_i32_0 = arith.constant 0 : i32
    %c0_i32_1 = arith.constant 0 : i32
    return %c0_i32, %c0_i32_0 : i32, i32
  }
  func.func @transform_4(%arg0: i32) -> (i32, i32) {
    %c0_i32 = arith.constant 0 : i32
    %c0_i32_0 = arith.constant 0 : i32
    %c0_i32_1 = arith.constant 0 : i32
    return %c0_i32, %c0_i32_0 : i32, i32
  }
  func.func @transform_5(%arg0: i32) -> (i32, i32) {
    %c0_i32 = arith.constant 0 : i32
    %c0_i32_0 = arith.constant 0 : i32
    return %arg0, %c0_i32 : i32, i32
  }
}

</mosaic_0001>

<bundles_post_ra>
// kernel: tpu_custom_call.1
= control target key start
LH: loop header
LB: loop body
LE: loop exit
PB: predicated region body
PF: predicated region fallthrough
CT: control target
= control target key end

     0   :  { %s307_s0 = inlined_call_operand.vmem [shape: f32[16,32], index: 0, kind: input, shape index: {}]   ;;  %s308_s1 = inlined_call_operand.vmem [shape: f32[32,128], index: 1, kind: input, shape index: {}]   ;;  %s309_s2 = inlined_call_operand.vmem [shape: f32[1,128], index: 2, kind: input, shape index: {}]   ;;  %s310_s3 = inlined_call_operand.vmem [shape: f32[128,32], index: 3, kind: input, shape index: {}]   ;;  %s311_s4 = inlined_call_operand.vmem [shape: f32[1,32], index: 4, kind: input, shape index: {}]   ;;  %s312_s5 = inlined_call_operand.hbm [shape: f32[16,32], index: 5, kind: output, shape index: {}]  }
   0x1   :  { %v26_v0 = vld [vmem:[%s308_s1 + $0x18] sm:$0xff]  ;;  %v25_v1 = vld [vmem:[%s308_s1 + $0x10] sm:$0xff]  ;;  %v24_v2 = vld [vmem:[%s308_s1 + $0x8] sm:$0xff] }
   0x2   :  { %50 = vmatpush.msra.mxu0 %v26_v0  ;;  %v94_v3 = vld [vmem:[%s310_s3 + $0x78] sm:$0xff]  ;;  %v93_v4 = vld [vmem:[%s310_s3 + $0x70] sm:$0xff]  ;;  %v23_v5 = vld [vmem:[%s308_s1] sm:$0xff] }
   0x3   :  { %99 = vmatpush.msra.mxu1 %v94_v3  ;;  %v92_v6 = vld [vmem:[%s310_s3 + $0x68] sm:$0xff]  ;;  %144 = vmatpush.msra.mxu2 %v94_v3 }
   0x4   :  { %51 = vmatpush.msra.mxu0 %v25_v1 }
   0x5   :  { %10 = vsyncpa [#allocation3], 0  ;;  %v21_v7 = vld [vmem:[%s307_s0] sm:$0xff]  ;;  %vm31_vm0 = vcmask 261120   ;;  %100 = vmatpush.msra.mxu1 %v93_v4  ;;  %145 = vmatpush.msra.mxu2 %v93_v4  ;;  %v22_v9 = vld [vmem:[%s307_s0 + $0x8] sm:$0xff]  ;;  %s195_s11 = smov [#allocation2]  }
   0x6   :  { %52 = vmatpush.msra.mxu0 %v24_v2  ;;  %v91_v8 = vld [vmem:[%s310_s3 + $0x60] sm:$0xff]  ;;  %v90_v10 = vld [vmem:[%s310_s3 + $0x58] sm:$0xff]  ;;  %v89_v11 = vld [vmem:[%s310_s3 + $0x50] sm:$0xff]  ;;  %s128_s12 = sshll.u32 %s195_s11, 4  ;;  %s130_s15 = sshll.u32 %s312_s5, 4  ;;  %s129_s12 = int_to_ptr.vmem [resolvable:$true] %s128_s12  ;;  %s131_s15 = int_to_ptr.hbm [resolvable:$true] %s130_s15 }
   0x7   :  { %101 = vmatpush.msra.mxu1 %v92_v6  ;;  %146 = vmatpush.msra.mxu2 %v92_v6  ;;  %v88_v12 = vld [vmem:[%s310_s3 + $0x48] sm:$0xff]  ;;  %v87_v13 = vld [vmem:[%s310_s3 + $0x40] sm:$0xff]  ;;  %v86_v14 = vld [vmem:[%s310_s3 + $0x38] sm:$0xff]  ;;  %s196_s16 = smov 128   ;;  %s197_s17 = smov 8  }
   0x8   :  { %53 = vmatpush.msra.mxu0 %v23_v5  ;;  %v85_v15 = vld [vmem:[%s310_s3 + $0x30] sm:$0xff]  ;;  %v84_v16 = vld [vmem:[%s310_s3 + $0x28] sm:$0xff]  ;;  %v83_v17 = vld [vmem:[%s310_s3 + $0x20] sm:$0xff] }
   0x9   :  { %142 = vmatmul.msk.f32.vlgmr.msra.gmra.mxu0 %vm31_vm0, %v21_v7  ;;  %102 = vmatpush.msra.mxu1 %v91_v8  ;;  %v82_v18 = vld [vmem:[%s310_s3 + $0x18] sm:$0xff]  ;;  %v81_v19 = vld [vmem:[%s310_s3 + $0x10] sm:$0xff]  ;;  %v80_v20 = vld [vmem:[%s310_s3 + $0x8] sm:$0xff] }
   0xa   :  { %147 = vmatpush.msra.mxu2 %v91_v8  ;;  %v79_v21 = vld [vmem:[%s310_s3] sm:$0xff] }
   0xb   :  { %103 = vmatpush.msra.mxu1 %v90_v10  ;;  %v163_v22 = vld [vmem:[%s309_s2] ss:$0 sm:$0xff] }
   0xc   :  { %148 = vmatpush.msra.mxu2 %v90_v10  ;;  %v164_v45 = vld [vmem:[%s311_s4] ss:$0 sm:$0xff] }
   0xd   :  { %104 = vmatpush.msra.mxu1 %v89_v11 }
   0xe   :  { %149 = vmatpush.msra.mxu2 %v89_v11 }
   0xf   :  { %105 = vmatpush.msra.mxu1 %v88_v12 }
  0x10   :  { %150 = vmatpush.msra.mxu2 %v88_v12 }
  0x11   :  { %143 = vmatmul.msk.f32.gmra.mxu0 %vm31_vm0, %v22_v9  ;;  %106 = vmatpush.msra.mxu1 %v87_v13 }
  0x12   :  { %151 = vmatpush.msra.mxu2 %v87_v13 }
  0x13   :  { %107 = vmatpush.msra.mxu1 %v86_v14 }
  0x14   :  { %152 = vmatpush.msra.mxu2 %v86_v14 }
  0x15   :  { %108 = vmatpush.msra.mxu1 %v85_v15 }
  0x16   :  { %153 = vmatpush.msra.mxu2 %v85_v15 }
  0x17   :  { %109 = vmatpush.msra.mxu1 %v84_v16 }
  0x18   :  { %154 = vmatpush.msra.mxu2 %v84_v16 }
  0x19   :  { %110 = vmatpush.msra.mxu1 %v83_v17 }
  0x1a   :  { %155 = vmatpush.msra.mxu2 %v83_v17 }
  0x1b   :  { %111 = vmatpush.msra.mxu1 %v82_v18 }
  0x1c   :  { %156 = vmatpush.msra.mxu2 %v82_v18 }
  0x1d   :  { %112 = vmatpush.msra.mxu1 %v81_v19 }
  0x1e   :  { %157 = vmatpush.msra.mxu2 %v81_v19 }
  0x1f   :  { %113 = vmatpush.msra.mxu1 %v80_v20 }
  0x20   :  { %158 = vmatpush.msra.mxu2 %v80_v20 }
  0x21   :  { %114 = vmatpush.msra.mxu1 %v79_v21 }
  0x22   :  { %159 = vmatpush.msra.mxu2 %v79_v21 }
  0x86   :  { %v55_v23 = vpop.f32.mrf.mxu0 }
  0x87   :  { %v56_v24 = vadd.f32 %v163_v22, %v55_v23 }
  0x89   :  { %v63_v25 = vmul.f32 %v56_v24, %v56_v24  ;;  %v61_v38 = vmul.f32 0.5, %v56_v24 }
  0x8b   :  { %v65_v26 = vmul.f32 %v63_v25, %v56_v24 }
  0x8d   :  { %v67_v27 = vmul.f32 0.044715, %v65_v26 }
  0x8e   :  { %v58_v28 = vpop.f32.mrf.mxu0 }
  0x8f   :  { %v59_v29 = vadd.f32 %v163_v22, %v58_v28  ;;  %v69_v30 = vadd.f32 %v67_v27, %v56_v24 }
  0x91   :  { %v64_v31 = vmul.f32 %v59_v29, %v59_v29  ;;  %v71_v32 = vmul.f32 0.7978846, %v69_v30  ;;  %v62_v42 = vmul.f32 0.5, %v59_v29 }
  0x93   :  { %v66_v33 = vmul.f32 %v64_v31, %v59_v29  ;;  %165 = vtanh.f32 %v71_v32 }
  0x95   :  { %v68_v34 = vmul.f32 0.044715, %v66_v33 }
  0x97   :  { %v70_v35 = vadd.f32 %v68_v34, %v59_v29 }
  0x99   :  { %v166_v36 = vpop.eup %165  ;;  %v72_v37 = vmul.f32 0.7978846, %v70_v35 }
  0x9a   :  { %v75_v39 = vadd.f32 1.0, %v166_v36 }
  0x9b   :  { %167 = vtanh.f32 %v72_v37 }
  0x9c   :  { %v77_v40 = vmul.f32 %v75_v39, %v61_v38 }
  0x9e   :  { %115 = vmatmul.f32.vlgmr.msra.gmra.mxu1 %v77_v40 }
  0xa1   :  { %v168_v41 = vpop.eup %167 }
  0xa2   :  { %v76_v43 = vadd.f32 1.0, %v168_v41 }
  0xa4   :  { %v78_v44 = vmul.f32 %v76_v43, %v62_v42 }
  0xa6   :  { %118 = vmatmul.f32.vlgmr.msra.gmra.mxu2 %v78_v44 }
 0x11b   :  { %v116_v46 = vpop.f32.mrf.mxu1 }
 0x11c   :  { %v117_v47 = vadd.f32 %v164_v45, %v116_v46 }
 0x11e   :  { %122 = vst.msk [vmem:[#allocation2] sm:$0xff] %vm31_vm0, %v117_v47 }
 0x129   :  { %v119_v48 = vpop.f32.mrf.mxu2 }
 0x12a   :  { %v120_v49 = vadd.f32 %v164_v45, %v119_v48 }
 0x12c   :  { %123 = vst.msk [vmem:[#allocation2 + $0x8] sm:$0xff] %vm31_vm0, %v120_v49 }
 0x12d   :  { %136 = dma.vmem_to_hbm [thread:$0]  %s129_s12, 256, %s131_s15, [#allocation3], %s196_s16, %s196_s16, %s197_s17  }
 0x12e   :  { %193 = dma.done.wait [#allocation3], 256  }
 0x12f   :  { %194 = vsyncadd [#allocation3], 4294967040 }
 0x130   :  { %141 = vsyncpa [#allocation3], 1 }

</bundles_post_ra>
